<compile_context>
chip_gen: v7x
topology: tpu7x:2x2x1
jax: 0.10.0
libtpu: 0.0.40
codegen_flags: <defaults>
</compile_context>

<pallas_src>
import functools

import jax
import jax.numpy as jnp
from jax.experimental import pallas as pl
from jax.experimental.pallas import tpu as pltpu


def _round_up(x, m):
    return ((x + m - 1) // m) * m


def _energy_tile_kernel(tok_ref, head_ref, uc_ref, vc_ref, out_ref):
    # tok_ref / head_ref : (tile_n, 1) int32 ids; padding rows hold the sentinel
    #                      `vocab_pad` -> all-zero one-hot -> contributes 0.
    # uc_ref / vc_ref    : (vocab_pad, dcp) bf16 bias-folded tables, VMEM
    #                      resident across the grid (constant index_map).
    # out_ref            : (1, 8, dcp) f32 lane-dense per-tile partial slab.
    tile_n = tok_ref.shape[0]
    vocab_pad = uc_ref.shape[0]
    dcp = uc_ref.shape[1]

    col = jax.lax.broadcasted_iota(jnp.int32, (tile_n, vocab_pad), 1)
    # One-hot values (0/1) are exact in bf16; feed the MXU bf16, accumulate f32.
    tok_oh = (tok_ref[...] == col).astype(jnp.bfloat16)      # (tile_n, vocab_pad)
    head_oh = (head_ref[...] == col).astype(jnp.bfloat16)    # (tile_n, vocab_pad)

    # Gather-by-matmul on the MXU; the bias/ones columns ride along for free.
    u_g = jnp.dot(tok_oh, uc_ref[...], preferred_element_type=jnp.float32)   # (tile_n, dcp)
    v_g = jnp.dot(head_oh, vc_ref[...], preferred_element_type=jnp.float32)  # (tile_n, dcp)

    prod = u_g * v_g                                          # (tile_n, dcp) f32
    # Sublane-only accumulation: fold rows 8-at-a-time with plain VPU adds
    # (no cross-lane XLU reduce, no 1024-element scalar broadcast per tile).
    slab = prod.reshape(tile_n // 8, 8, dcp).sum(axis=0)      # (8, dcp)
    out_ref[...] = slab[None, :, :]


def fold_tables(U, V, Ubias, Vbias):
    """Fold biases into the tables and lay them out for the kernel.

    Returns bf16 tables of shape (vocab_pad, dcp):
        Uc = [U | Ubias | 1 | zeros],   Vc = [V | 1 | Vbias | zeros]
    so Uc[t] * Vc[h] sums (over lanes) to U[t].V[h] + Ubias[t] + Vbias[h].
    Hoist this out of the hot path: recompute once per parameter update.
    """
    vocab, dim = U.shape
    dc = dim + 2
    dcp = _round_up(dc, 128)          # lane-dense output width (zero-padded)
    vocab_pad = _round_up(vocab, 8)   # sublane alignment of the table block

    ones = jnp.ones((vocab, 1), jnp.float32)
    uc = jnp.concatenate(
        [U.astype(jnp.float32), Ubias.astype(jnp.float32).reshape(vocab, 1), ones], axis=1)
    vc = jnp.concatenate(
        [V.astype(jnp.float32), ones, Vbias.astype(jnp.float32).reshape(vocab, 1)], axis=1)

    pad = ((0, vocab_pad - vocab), (0, dcp - dc))
    uc = jnp.pad(uc, pad).astype(jnp.bfloat16)
    vc = jnp.pad(vc, pad).astype(jnp.bfloat16)
    return uc, vc


def batch_energy(tokens_batch, heads_batch, uc, vc, *, tile_n=512):
    """Pallas implementation of EmbeddingLayer.forward (== batch_energy).

    tokens_batch / heads_batch : integer id tensors of identical shape.
    uc / vc                    : bias-folded bf16 tables from fold_tables().
    """
    assert tokens_batch.shape == heads_batch.shape
    assert tile_n % 8 == 0, "tile_n must be a multiple of 8 (sublane alignment)"
    vocab_pad, dcp = uc.shape

    n = int(tokens_batch.size)
    num_tiles = pl.cdiv(n, tile_n)
    n_pad = num_tiles * tile_n
    pad = n_pad - n

    # Sentinel padding: id == vocab_pad is strictly out of [0, vocab_pad), so the
    # one-hot row is all-zero and the padded row contributes 0.  No mask stream.
    tok = jnp.pad(tokens_batch.reshape(-1).astype(jnp.int32), (0, pad),
                  constant_values=vocab_pad).reshape(n_pad, 1)
    head = jnp.pad(heads_batch.reshape(-1).astype(jnp.int32), (0, pad),
                   constant_values=vocab_pad).reshape(n_pad, 1)

    partials = pl.pallas_call(
        _energy_tile_kernel,
        out_shape=jax.ShapeDtypeStruct((num_tiles, 8, dcp), jnp.float32),
        grid_spec=pltpu.PrefetchScalarGridSpec(
            num_scalar_prefetch=0,
            grid=(num_tiles,),
            in_specs=[
                pl.BlockSpec((tile_n, 1), lambda t: (t, 0)),       # token ids (tile)
                pl.BlockSpec((tile_n, 1), lambda t: (t, 0)),       # head ids (tile)
                pl.BlockSpec((vocab_pad, dcp), lambda t: (0, 0)),  # Uc, VMEM resident
                pl.BlockSpec((vocab_pad, dcp), lambda t: (0, 0)),  # Vc, VMEM resident
            ],
            out_specs=pl.BlockSpec((1, 8, dcp), lambda t: (t, 0, 0)),
        ),
        compiler_params=pltpu.CompilerParams(
            dimension_semantics=("parallel",)),
    )(tok, head, uc, vc)

    # Single cross-lane reduction over all per-tile slabs (padded lanes are 0).
    return jnp.sum(partials)


@functools.partial(jax.jit, static_argnames=("tile_n",))
def embedding_forward(tokens_batch, heads_batch, U, V, Ubias, Vbias, tile_n=512):
    """Convenience jitted forward; prefer precomputing fold_tables() per update."""
    uc, vc = fold_tables(U, V, Ubias, Vbias)
    return batch_energy(tokens_batch, heads_batch, uc, vc, tile_n=tile_n)


if __name__ == "__main__":
    vocab_size = 64
    embedding_dimension = 32
    batch = 2
    seq = 8

    key = jax.random.PRNGKey(0)
    k_u, k_v, k_ub, k_vb, k_tok, k_head = jax.random.split(key, 6)

    scale = 1.0 / jnp.sqrt(jnp.float32(embedding_dimension))
    U = jax.random.normal(k_u, (vocab_size, embedding_dimension), jnp.float32) * scale
    V = jax.random.normal(k_v, (vocab_size, embedding_dimension), jnp.float32) * scale
    Ubias = jax.random.normal(k_ub, (vocab_size, 1), jnp.float32)
    Vbias = jax.random.normal(k_vb, (vocab_size, 1), jnp.float32)

    tokens_batch = jax.random.randint(k_tok, (batch, seq), 0, vocab_size, jnp.int32)
    heads_batch = jax.random.randint(k_head, (batch, seq), 0, vocab_size, jnp.int32)

    # Pure-JAX reference (mirrors the PyTorch forward exactly).
    def ref_energy(Ur, Vr, Ubr, Vbr):
        return jnp.sum(
            jnp.sum(Ur[tokens_batch] * Vr[heads_batch], axis=-1)
            + Ubr[tokens_batch][..., 0]
            + Vbr[heads_batch][..., 0])

    ref_f32 = ref_energy(U, V, Ubias, Vbias)
    q = lambda a: a.astype(jnp.bfloat16).astype(jnp.float32)
    ref_bf16 = ref_energy(q(U), q(V), q(Ubias), q(Vbias))  # tables rounded like the kernel

    # (a) multi-tile parallel grid, no padding rows (N=16, tile_n=8 -> 2 tiles).
    res_a = jax.block_until_ready(
        embedding_forward(tokens_batch, heads_batch, U, V, Ubias, Vbias, tile_n=8))
    # (b) single large tile with sentinel-padded rows (N=16 padded to 512).
    res_b = jax.block_until_ready(
        embedding_forward(tokens_batch, heads_batch, U, V, Ubias, Vbias, tile_n=512))
    # (c) hoisted tables: fold once, call the kernel wrapper directly.
    uc, vc = fold_tables(U, V, Ubias, Vbias)
    res_c = jax.block_until_ready(
        batch_energy(tokens_batch, heads_batch, uc, vc, tile_n=128))

    for res in (res_a, res_b, res_c):
        # Tight check: kernel matches the bf16-rounded-table reference up to f32
        # summation-order round-off.
        assert jnp.allclose(res, ref_bf16, rtol=1e-3, atol=1e-3), (res, ref_bf16)
        # Loose check vs. exact f32 module semantics (only bf16 table rounding).
        assert jnp.allclose(res, ref_f32, rtol=5e-2, atol=5e-1), (res, ref_f32)

    print("KERNEL_OK")
</pallas_src>

<mosaic_0001>
module attributes {stable_mosaic.version = 11 : i64} {
  func.func @_energy_tile_kernel(%arg0: i32, %arg1: memref<8x1xi32, #tpu.memory_space<vmem>>, %arg2: memref<8x1xi32, #tpu.memory_space<vmem>>, %arg3: memref<64x128xbf16, #tpu.memory_space<vmem>>, %arg4: memref<64x128xbf16, #tpu.memory_space<vmem>>, %arg5: memref<1x8x128xf32, #tpu.memory_space<vmem>>) attributes {dimension_semantics = [#tpu.dimension_semantics<parallel>], iteration_bounds = array<i64: 2>, scalar_prefetch = 0 : i64, scratch_operands = 0 : i64, tpu.core_type = #tpu.core_type<tc>, window_params = [{transform_indices = @transform_0, window_bounds = array<i64: 8, 1>}, {transform_indices = @transform_1, window_bounds = array<i64: 8, 1>}, {pipeline_mode = #tpu.pipeline_mode<synchronous>, transform_indices = @transform_2, window_bounds = array<i64: 64, 128>}, {pipeline_mode = #tpu.pipeline_mode<synchronous>, transform_indices = @transform_3, window_bounds = array<i64: 64, 128>}, {transform_indices = @transform_4, window_bounds = array<i64: 1, 8, 128>}]} {
    %0 = tpu.iota {dimensions = array<i32: 1>} : vector<8x64xi32>
    %c0 = arith.constant 0 : index
    %c0_0 = arith.constant 0 : index
    %1 = vector.load %arg1[%c0, %c0_0] : memref<8x1xi32, #tpu.memory_space<vmem>>, vector<8x1xi32>
    %2 = vector.broadcast %1 : vector<8x1xi32> to vector<8x64xi32>
    %3 = arith.cmpi eq, %2, %0 : vector<8x64xi32>
    %4 = arith.extui %3 : vector<8x64xi1> to vector<8x64xi32>
    %5 = arith.sitofp %4 : vector<8x64xi32> to vector<8x64xf32>
    %6 = arith.truncf %5 : vector<8x64xf32> to vector<8x64xbf16>
    %c0_1 = arith.constant 0 : index
    %c0_2 = arith.constant 0 : index
    %7 = vector.load %arg2[%c0_1, %c0_2] : memref<8x1xi32, #tpu.memory_space<vmem>>, vector<8x1xi32>
    %8 = vector.broadcast %7 : vector<8x1xi32> to vector<8x64xi32>
    %9 = arith.cmpi eq, %8, %0 : vector<8x64xi32>
    %10 = arith.extui %9 : vector<8x64xi1> to vector<8x64xi32>
    %11 = arith.sitofp %10 : vector<8x64xi32> to vector<8x64xf32>
    %12 = arith.truncf %11 : vector<8x64xf32> to vector<8x64xbf16>
    %c0_3 = arith.constant 0 : index
    %c0_4 = arith.constant 0 : index
    %13 = vector.load %arg3[%c0_3, %c0_4] : memref<64x128xbf16, #tpu.memory_space<vmem>>, vector<64x128xbf16>
    %cst = arith.constant dense<0.000000e+00> : vector<8x128xf32>
    %14 = tpu.matmul %6, %13, %cst {dimension_numbers = #tpu.dot_dimension_numbers<[1], [0], [0], [1], [0, 0, 1, 1], [], []>} : vector<8x64xbf16>, vector<64x128xbf16>, vector<8x128xf32> -> vector<8x128xf32>
    %c0_5 = arith.constant 0 : index
    %c0_6 = arith.constant 0 : index
    %15 = vector.load %arg4[%c0_5, %c0_6] : memref<64x128xbf16, #tpu.memory_space<vmem>>, vector<64x128xbf16>
    %cst_7 = arith.constant dense<0.000000e+00> : vector<8x128xf32>
    %16 = tpu.matmul %12, %15, %cst_7 {dimension_numbers = #tpu.dot_dimension_numbers<[1], [0], [0], [1], [0, 0, 1, 1], [], []>} : vector<8x64xbf16>, vector<64x128xbf16>, vector<8x128xf32> -> vector<8x128xf32>
    %17 = arith.mulf %14, %16 : vector<8x128xf32>
    %18 = vector.shape_cast %17 : vector<8x128xf32> to vector<1x8x128xf32>
    %cst_8 = arith.constant dense<0.000000e+00> : vector<8x128xf32>
    %19 = vector.multi_reduction <add>, %18, %cst_8 [0] : vector<1x8x128xf32> to vector<8x128xf32>
    %20 = vector.shape_cast %19 : vector<8x128xf32> to vector<1x8x128xf32>
    %c0_9 = arith.constant 0 : index
    %c0_10 = arith.constant 0 : index
    %c0_11 = arith.constant 0 : index
    %21 = vector.load %arg5[%c0_9, %c0_10, %c0_11] : memref<1x8x128xf32, #tpu.memory_space<vmem>>, vector<1x8x128xf32>
    tpu.vector_store %arg5[%c0_9, %c0_10, %c0_11], %20 {strides = array<i32>} : memref<1x8x128xf32, #tpu.memory_space<vmem>>, vector<1x8x128xf32>,
    return
  }
  func.func @transform_0(%arg0: i32) -> (i32, i32) {
    %c0_i32 = arith.constant 0 : i32
    %c0_i32_0 = arith.constant 0 : i32
    return %arg0, %c0_i32 : i32, i32
  }
  func.func @transform_1(%arg0: i32) -> (i32, i32) {
    %c0_i32 = arith.constant 0 : i32
    %c0_i32_0 = arith.constant 0 : i32
    return %arg0, %c0_i32 : i32, i32
  }
  func.func @transform_2(%arg0: i32) -> (i32, i32) {
    %c0_i32 = arith.constant 0 : i32
    %c0_i32_0 = arith.constant 0 : i32
    %c0_i32_1 = arith.constant 0 : i32
    return %c0_i32, %c0_i32_0 : i32, i32
  }
  func.func @transform_3(%arg0: i32) -> (i32, i32) {
    %c0_i32 = arith.constant 0 : i32
    %c0_i32_0 = arith.constant 0 : i32
    %c0_i32_1 = arith.constant 0 : i32
    return %c0_i32, %c0_i32_0 : i32, i32
  }
  func.func @transform_4(%arg0: i32) -> (i32, i32, i32) {
    %c0_i32 = arith.constant 0 : i32
    %c0_i32_0 = arith.constant 0 : i32
    %c0_i32_1 = arith.constant 0 : i32
    return %arg0, %c0_i32, %c0_i32_0 : i32, i32, i32
  }
}

</mosaic_0001>

<bundles_post_ra>
// kernel: embedding_forward.1
= control target key start
LH: loop header
LB: loop body
LE: loop exit
PB: predicated region body
PF: predicated region fallthrough
CT: control target
= control target key end

     0   :  { %s560_s15 = smov 0   ;;  %s609_s0 = inlined_call_operand.vmem [shape: s32[16,1], index: 0, kind: input, shape index: {}]   ;;  %s610_s1 = inlined_call_operand.vmem [shape: s32[16,1], index: 1, kind: input, shape index: {}]   ;;  %s611_s2 = inlined_call_operand.vmem [shape: bf16[64,128], index: 2, kind: input, shape index: {}]   ;;  %s612_s3 = inlined_call_operand.vmem [shape: bf16[64,128], index: 3, kind: input, shape index: {}]   ;;  %s613_s4 = inlined_call_operand.vmem [shape: f32[2,8,128], index: 4, kind: output, shape index: {}]  }
   0x1 LB: > { %s448_s16 = sadd.s32 4294967295, %s530_s15   ;;  %p452_p0 = scmp.ge.s32.totalorder %s530_s15, 1  ;;  %s530_s15 = sphi %s560_s15, %s14_s15  }
   0x2   : > { %p170_p1 = scmp.lt.s32.totalorder %s530_s15, 3 }
   0x4   : > { %p171_p2 = pnand %p452_p0, %p170_p1 }
   0x5   : > { %p198_p3 = scmp.lt.s32.totalorder (!%p171_p2), %s448_s16, 1  ;;  %v516_v0 = vld [vmem:[%s611_s2] sm:$0xff] (!%p171_p2)   ;;  %v532_v1 = vmov (!%p171_p2), 0   ;;  %v533_v2 = vmov (!%p171_p2), 0.0   ;;  %v517_v3 = vld [vmem:[%s611_s2 + $0x8] sm:$0xff] (!%p171_p2)   ;;  %v519_v7 = vld [vmem:[%s611_s2 + $0x10] sm:$0xff] (!%p171_p2)   ;;  %v211_v12 = vlaneseq (!%p171_p2) }
   0x6   : > { %174 = sbr.rel (%p171_p2) target bundleno = 368 (0x170), region = 36  ;;  %515 = vset.pattern.permute.xlu0 (!%p171_p2), %v532_v1  ;;  %480 = vmatprep.subr.bf16.mxu0 (!%p171_p2), %v533_v2  ;;  %v518_v4 = vld [vmem:[%s612_s3] sm:$0xff] (!%p171_p2)   ;;  %v520_v5 = vld [vmem:[%s612_s3 + $0x8] sm:$0xff] (!%p171_p2)   ;;  %v522_v9 = vld [vmem:[%s612_s3 + $0x10] sm:$0xff] (!%p171_p2)   ;;  %vm534_vm0 = vmmov (!%p171_p2), 0   ;;  %vm261_vm2 = vcmask (!%p171_p2), 523264  }
   0x7   : > { %481 = vmatpush3.bf16.msra.mxu0 (!%p171_p2), %v516_v0  ;;  %492 = vmatprep.subr.bf16.mxu1 (!%p171_p2), %v533_v2  ;;  %v521_v10 = vld [vmem:[%s611_s2 + $0x18] sm:$0xff] (!%p171_p2)   ;;  %v212_v13 = vand.u32 (!%p171_p2), 127, %v211_v12 }
   0x8   : > { %482 = vmatprep.subr.bf16.mxu0 (!%p171_p2), %v533_v2  ;;  %493 = vmatpush3.bf16.msra.mxu1 (!%p171_p2), %v518_v4  ;;  %v523_v11 = vld [vmem:[%s612_s3 + $0x18] sm:$0xff] (!%p171_p2)  }
   0x9   : > { %494 = vmatprep.subr.bf16.mxu1 (!%p171_p2), %v533_v2  ;;  %488 = vmatprep.mubr.msk.bf16.mxu0 (!%p171_p2), %vm534_vm0, %v533_v2 }
   0xa   : > { %500 = vmatprep.mubr.msk.bf16.mxu1 (!%p171_p2), %vm534_vm0, %v533_v2 }
   0xb   : > { %483 = vmatpush3.bf16.msra.mxu0 (!%p171_p2), %v517_v3 }
   0xc   : > { %484 = vmatprep.subr.bf16.mxu0 (!%p171_p2), %v533_v2  ;;  %495 = vmatpush3.bf16.msra.mxu1 (!%p171_p2), %v520_v5 }
   0xd   : > { %s615_s16 = smov (!%p198_p3, %s448_s16), 1  ;;  %496 = vmatprep.subr.bf16.mxu1 %v533_v2 }
   0xe   : > { %s577_s23 = sshll.u32 %s615_s16, 3 }
   0xf   : > { %s201_s26 = scalar_lea.vmem %s609_s0, %s577_s23  ;;  %s205_s29 = scalar_lea.vmem %s610_s1, %s577_s23  ;;  %485 = vmatpush3.bf16.msra.mxu0 %v519_v7 }
  0x10   : > { %v213_v6 = vld [vmem:[%s201_s26] sm:$0xff]  ;;  %486 = vmatprep.subr.bf16.mxu0 %v533_v2  ;;  %497 = vmatpush3.bf16.msra.mxu1 %v522_v9  ;;  %s209_s17 = scalar_lea.vmem %s613_s4, %s577_s23 }
  0x11   : > { %215 = vperm.xlu0 %515, %v213_v6   ;;  %v221_v8 = vld [vmem:[%s205_s29] sm:$0xff]  ;;  %498 = vmatprep.subr.bf16.mxu1 %v533_v2 }
  0x13   : > { %487 = vmatpush3.bf16.msra.mxu0 %v521_v10 }
  0x14   : > { %499 = vmatpush3.bf16.msra.mxu1 %v523_v11 }
  0x15   : > { %223 = vperm.xlu0 %515, %v221_v8  }
  0x90   : > { %v216_v14 = vpop.permute.xlu0 %215 }
  0x91   : > { %vm217_vm1 = vcmp.eq.s32.totalorder %v216_v14, %v212_v13 }
  0x92   : > { %v456_v15 = vsel %vm217_vm1, 1.0, %v533_v2 }
  0x93   : > { %v220_v16 = vpack.c.bf16 %v456_v15, %v456_v15 }
  0x94   : > { %v224_v17 = vpop.permute.xlu0 %223 }
  0x95   : > { %vm225_vm3 = vcmp.eq.s32.totalorder %v224_v17, %v212_v13  ;;  %489 = vmatmul.mubr.msk.bf16.vlgmr.msra.gmra.mrb[0].mxu0 %vm261_vm2, %v220_v16 }
  0x96   : > { %v457_v18 = vsel %vm225_vm3, 1.0, %v533_v2 }
  0x97   : > { %v228_v19 = vpack.c.bf16 %v457_v18, %v457_v18 }
  0x99   : > { %501 = vmatmul.mubr.msk.bf16.vlgmr.msra.gmra.mrb[0].mxu1 %vm261_vm2, %v228_v19 }
 0x168   : > { %v299_v20 = vpop.f32.mrb[0].mxu0 }
 0x169   : > { %v490_v21 = vpop.f32.mrb[1].mxu0 }
 0x16a   : > { %v302_v22 = vpop.f32.mrb[2].mxu0 }
 0x16b   : > { %v491_v23 = vpop.f32.mrb[3].mxu0 }
 0x16c   : > { %v374_v24 = vpop.f32.mrb[0].mxu1 }
 0x16d   : > { %v380_v25 = vmul.f32 %v374_v24, %v299_v20  ;;  %v502_v26 = vpop.f32.mrb[1].mxu1 }
 0x16e   : > { %v377_v27 = vpop.f32.mrb[2].mxu1 }
 0x16f   : > { %382 = vst [vmem:[%s209_s17] sm:$0xff] %v380_v25  ;;  %v503_v28 = vpop.f32.mrb[3].mxu1 }
 0x170 PF: > { %s14_s15 = sadd.s32 1, %s530_s15  }
 0x171   : > { %p11_p4 = scmp.ge.s32.totalorder %s14_s15, 4  }
 0x173   :  { %13 = sbr.rel (!%p11_p4) target bundleno = 1 (0x1), region = 69 }

</bundles_post_ra>
